<compile_context>
chip_gen: v7x
topology: tpu7x:2x2x1
jax: 0.10.0
libtpu: 0.0.40
codegen_flags: <defaults>
</compile_context>

<pallas_src>
import jax
import jax.numpy as jnp
from jax.experimental import pallas as pl
from jax.experimental.pallas import tpu as pltpu  # noqa: F401  (TPU backend)


# --------------------------------------------------------------------------
# Fused kernel: both SGC layers + K-hop propagation in one VMEM-resident pass
# --------------------------------------------------------------------------
def _fused_sgc_kernel(K: int):
    def kernel(a_ref, x_ref, w1_ref, b1_ref, w2_ref, b2_ref, o_ref):
        a = a_ref[...]                                        # bf16 [Np, Np]

        # ---- layer 1:  ReLU( A_hat^K (X W1) + b1 ) ----------------------
        t = jnp.dot(x_ref[...], w1_ref[...],                  # [Np, Hp] f32
                    preferred_element_type=jnp.float32)
        for _ in range(K):                                    # feature hops
            t = jnp.dot(a, t.astype(jnp.bfloat16),
                        preferred_element_type=jnp.float32)
        h = jnp.maximum(t + b1_ref[...], 0.0)                 # f32 epilogue

        # ---- layer 2:  A_hat^K (h W2) + b2 -------------------------------
        t = jnp.dot(h.astype(jnp.bfloat16), w2_ref[...],
                    preferred_element_type=jnp.float32)
        for _ in range(K):
            t = jnp.dot(a, t.astype(jnp.bfloat16),
                        preferred_element_type=jnp.float32)
        o_ref[...] = (t + b2_ref[...]).astype(o_ref.dtype)    # cast at store

    return kernel


# --------------------------------------------------------------------------
# One-time operand preparation (hoisted: SGConv is cached => A_hat is fixed)
# --------------------------------------------------------------------------
def _round_up(n: int, m: int) -> int:
    return ((n + m - 1) // m) * m


def prepare_sgc_operands(a_hat, x, w1, b1, w2, b2):
    """Pad to lane-dense 128 multiples and cast MXU inputs to bf16 ONCE.

    Zero padding is exact: padded rows/cols of A_hat are zero, padded rows /
    feature cols of X are zero, padded rows/cols of W and cols of b are zero,
    so the top-left [N, hidden] block of the output is unchanged.
    """
    N, f_in = x.shape
    hid = w1.shape[1]

    Np = _round_up(N, 128)
    Fp = _round_up(f_in, 128)
    Hp = _round_up(hid, 128)

    a_pad = jnp.zeros((Np, Np), jnp.bfloat16).at[:N, :N].set(
        a_hat.astype(jnp.bfloat16))
    x_pad = jnp.zeros((Np, Fp), jnp.bfloat16).at[:N, :f_in].set(
        x.astype(jnp.bfloat16))
    w1_pad = jnp.zeros((Fp, Hp), jnp.bfloat16).at[:f_in, :hid].set(
        w1.astype(jnp.bfloat16))
    w2_pad = jnp.zeros((Hp, Hp), jnp.bfloat16).at[:hid, :hid].set(
        w2.astype(jnp.bfloat16))
    b1_pad = jnp.zeros((1, Hp), jnp.float32).at[0, :hid].set(b1)
    b2_pad = jnp.zeros((1, Hp), jnp.float32).at[0, :hid].set(b2)

    operands = (a_pad, x_pad, w1_pad, b1_pad, w2_pad, b2_pad)
    return operands, (N, hid)


# --------------------------------------------------------------------------
# Forward pass: a single pallas_call, everything resident in VMEM
# --------------------------------------------------------------------------
def sgc_forward_pallas(operands, *, K: int, num_nodes: int, hidden_dim: int):
    a_pad, x_pad, w1_pad, b1_pad, w2_pad, b2_pad = operands
    Np = a_pad.shape[0]
    Hp = w1_pad.shape[1]

    out_pad = pl.pallas_call(
        _fused_sgc_kernel(K),
        out_shape=jax.ShapeDtypeStruct((Np, Hp), jnp.float32),
    )(a_pad, x_pad, w1_pad, b1_pad, w2_pad, b2_pad)

    return out_pad[:num_nodes, :hidden_dim]


# --------------------------------------------------------------------------
# Graph preprocessing (plain-JAX glue) and reference
# --------------------------------------------------------------------------
def build_normalized_adjacency(edge_index, num_nodes):
    """Dense gcn_norm: add self loops, symmetric D^{-1/2}(A+I)D^{-1/2}.

    Row = dst, col = src, matching PyG's source->target message flow so that
    (A_hat @ x)[i] aggregates messages arriving at node i.
    """
    src, dst = edge_index[0], edge_index[1]
    a = jnp.zeros((num_nodes, num_nodes), jnp.float32)
    a = a.at[dst, src].add(1.0)
    a = a + jnp.eye(num_nodes, dtype=jnp.float32)   # self loops (fill_value=1)
    deg = a.sum(axis=1)
    d_inv_sqrt = jnp.where(deg > 0, 1.0 / jnp.sqrt(deg), 0.0)
    return d_inv_sqrt[:, None] * a * d_inv_sqrt[None, :]


def reference_sgc(a_hat, x, w1, b1, w2, b2, K):
    h = x
    for _ in range(K):
        h = a_hat @ h
    h = jnp.maximum(h @ w1 + b1, 0.0)
    for _ in range(K):
        h = a_hat @ h
    return h @ w2 + b2


# --------------------------------------------------------------------------
# Main
# --------------------------------------------------------------------------
if __name__ == "__main__":
    # Small, deterministic problem: 128 nodes, 16 input feats, 32 hidden, K=2.
    N, INPUT_DIM, HIDDEN_DIM, K, E = 128, 16, 32, 2, 512

    key = jax.random.PRNGKey(0)
    k_x, k_e0, k_e1, k_w1, k_b1, k_w2, k_b2 = jax.random.split(key, 7)

    x = jax.random.normal(k_x, (N, INPUT_DIM), jnp.float32)
    edge_index = jnp.stack([
        jax.random.randint(k_e0, (E,), 0, N),
        jax.random.randint(k_e1, (E,), 0, N),
    ])  # [2, E]

    # Deterministic parameter init (uniform, torch.nn.Linear-style bounds).
    def lin_init(kw, kb, fan_in, fan_out):
        bound = 1.0 / jnp.sqrt(jnp.float32(fan_in))
        w = jax.random.uniform(kw, (fan_in, fan_out), jnp.float32, -bound, bound)
        b = jax.random.uniform(kb, (fan_out,), jnp.float32, -bound, bound)
        return w, b

    w1, b1 = lin_init(k_w1, k_b1, INPUT_DIM, HIDDEN_DIM)
    w2, b2 = lin_init(k_w2, k_b2, INPUT_DIM if False else HIDDEN_DIM, HIDDEN_DIM)

    a_hat = build_normalized_adjacency(edge_index, N)

    # One-time prep (cached=True semantics), then the fused forward.
    operands, (n_nodes, hid) = prepare_sgc_operands(a_hat, x, w1, b1, w2, b2)
    out = sgc_forward_pallas(operands, K=K, num_nodes=n_nodes, hidden_dim=hid)
    out = jax.block_until_ready(out)

    ref = reference_sgc(a_hat, x, w1, b1, w2, b2, K)
    assert out.shape == (N, HIDDEN_DIM)
    # bf16 MXU inputs (f32 accumulation) -> relaxed tolerance vs the f32 ref.
    assert jnp.allclose(out, ref, atol=5e-2, rtol=5e-2), (
        float(jnp.max(jnp.abs(out - ref))))

    print("KERNEL_OK")
</pallas_src>

<mosaic_0001>
module attributes {stable_mosaic.version = 11 : i64} {
  func.func @kernel(%arg0: memref<128x128xbf16, #tpu.memory_space<vmem>>, %arg1: memref<128x128xbf16, #tpu.memory_space<vmem>>, %arg2: memref<128x128xbf16, #tpu.memory_space<vmem>>, %arg3: memref<1x128xf32, #tpu.memory_space<vmem>>, %arg4: memref<128x128xbf16, #tpu.memory_space<vmem>>, %arg5: memref<1x128xf32, #tpu.memory_space<vmem>>, %arg6: memref<128x128xf32, #tpu.memory_space<vmem>>) attributes {dimension_semantics = [], scalar_prefetch = 0 : i64, scratch_operands = 0 : i64, tpu.core_type = #tpu.core_type<tc>} {
    %c0 = arith.constant 0 : index
    %c0_0 = arith.constant 0 : index
    %0 = vector.load %arg0[%c0, %c0_0] : memref<128x128xbf16, #tpu.memory_space<vmem>>, vector<128x128xbf16>
    %c0_1 = arith.constant 0 : index
    %c0_2 = arith.constant 0 : index
    %1 = vector.load %arg1[%c0_1, %c0_2] : memref<128x128xbf16, #tpu.memory_space<vmem>>, vector<128x128xbf16>
    %c0_3 = arith.constant 0 : index
    %c0_4 = arith.constant 0 : index
    %2 = vector.load %arg2[%c0_3, %c0_4] : memref<128x128xbf16, #tpu.memory_space<vmem>>, vector<128x128xbf16>
    %cst = arith.constant dense<0.000000e+00> : vector<128x128xf32>
    %3 = tpu.matmul %1, %2, %cst {dimension_numbers = #tpu.dot_dimension_numbers<[1], [0], [0], [1], [0, 0, 1, 1], [], []>} : vector<128x128xbf16>, vector<128x128xbf16>, vector<128x128xf32> -> vector<128x128xf32>
    %4 = arith.truncf %3 : vector<128x128xf32> to vector<128x128xbf16>
    %cst_5 = arith.constant dense<0.000000e+00> : vector<128x128xf32>
    %5 = tpu.matmul %0, %4, %cst_5 {dimension_numbers = #tpu.dot_dimension_numbers<[1], [0], [0], [1], [0, 0, 1, 1], [], []>} : vector<128x128xbf16>, vector<128x128xbf16>, vector<128x128xf32> -> vector<128x128xf32>
    %6 = arith.truncf %5 : vector<128x128xf32> to vector<128x128xbf16>
    %cst_6 = arith.constant dense<0.000000e+00> : vector<128x128xf32>
    %7 = tpu.matmul %0, %6, %cst_6 {dimension_numbers = #tpu.dot_dimension_numbers<[1], [0], [0], [1], [0, 0, 1, 1], [], []>} : vector<128x128xbf16>, vector<128x128xbf16>, vector<128x128xf32> -> vector<128x128xf32>
    %c0_7 = arith.constant 0 : index
    %c0_8 = arith.constant 0 : index
    %8 = vector.load %arg3[%c0_7, %c0_8] : memref<1x128xf32, #tpu.memory_space<vmem>>, vector<1x128xf32>
    %9 = vector.broadcast %8 : vector<1x128xf32> to vector<128x128xf32>
    %10 = arith.addf %7, %9 : vector<128x128xf32>
    %cst_9 = arith.constant 0.000000e+00 : f32
    %11 = vector.broadcast %cst_9 : f32 to vector<128x128xf32>
    %12 = arith.maximumf %10, %11 : vector<128x128xf32>
    %13 = arith.truncf %12 : vector<128x128xf32> to vector<128x128xbf16>
    %c0_10 = arith.constant 0 : index
    %c0_11 = arith.constant 0 : index
    %14 = vector.load %arg4[%c0_10, %c0_11] : memref<128x128xbf16, #tpu.memory_space<vmem>>, vector<128x128xbf16>
    %cst_12 = arith.constant dense<0.000000e+00> : vector<128x128xf32>
    %15 = tpu.matmul %13, %14, %cst_12 {dimension_numbers = #tpu.dot_dimension_numbers<[1], [0], [0], [1], [0, 0, 1, 1], [], []>} : vector<128x128xbf16>, vector<128x128xbf16>, vector<128x128xf32> -> vector<128x128xf32>
    %16 = arith.truncf %15 : vector<128x128xf32> to vector<128x128xbf16>
    %cst_13 = arith.constant dense<0.000000e+00> : vector<128x128xf32>
    %17 = tpu.matmul %0, %16, %cst_13 {dimension_numbers = #tpu.dot_dimension_numbers<[1], [0], [0], [1], [0, 0, 1, 1], [], []>} : vector<128x128xbf16>, vector<128x128xbf16>, vector<128x128xf32> -> vector<128x128xf32>
    %18 = arith.truncf %17 : vector<128x128xf32> to vector<128x128xbf16>
    %cst_14 = arith.constant dense<0.000000e+00> : vector<128x128xf32>
    %19 = tpu.matmul %0, %18, %cst_14 {dimension_numbers = #tpu.dot_dimension_numbers<[1], [0], [0], [1], [0, 0, 1, 1], [], []>} : vector<128x128xbf16>, vector<128x128xbf16>, vector<128x128xf32> -> vector<128x128xf32>
    %c0_15 = arith.constant 0 : index
    %c0_16 = arith.constant 0 : index
    %20 = vector.load %arg5[%c0_15, %c0_16] : memref<1x128xf32, #tpu.memory_space<vmem>>, vector<1x128xf32>
    %21 = vector.broadcast %20 : vector<1x128xf32> to vector<128x128xf32>
    %22 = arith.addf %19, %21 : vector<128x128xf32>
    %c0_17 = arith.constant 0 : index
    %c0_18 = arith.constant 0 : index
    %23 = vector.load %arg6[%c0_17, %c0_18] : memref<128x128xf32, #tpu.memory_space<vmem>>, vector<128x128xf32>
    tpu.vector_store %arg6[%c0_17, %c0_18], %22 {strides = array<i32>} : memref<128x128xf32, #tpu.memory_space<vmem>>, vector<128x128xf32>,
    return
  }
}

</mosaic_0001>

<bundles_post_ra>
// kernel: tpu_custom_call.1
= control target key start
LH: loop header
LB: loop body
LE: loop exit
PB: predicated region body
PF: predicated region fallthrough
CT: control target
= control target key end

     0   :  { %11 = vsyncpa [#allocation3], 0  ;;  %s1688_s0 = inlined_call_operand.hbm [shape: bf16[128,128], index: 0, kind: input, shape index: {}]   ;;  %s1689_s1 = inlined_call_operand.hbm [shape: bf16[128,128], index: 1, kind: input, shape index: {}]   ;;  %s1690_s2 = inlined_call_operand.hbm [shape: bf16[128,128], index: 2, kind: input, shape index: {}]   ;;  %s1691_s3 = inlined_call_operand.vmem [shape: f32[1,128], index: 3, kind: input, shape index: {}]   ;;  %s1692_s4 = inlined_call_operand.hbm [shape: bf16[128,128], index: 4, kind: input, shape index: {}]   ;;  %s1693_s5 = inlined_call_operand.vmem [shape: f32[1,128], index: 5, kind: input, shape index: {}]   ;;  %s1694_s6 = inlined_call_operand.hbm [shape: f32[128,128], index: 6, kind: output, shape index: {}]  }
   0x1   :  { %12 = vsyncpa [#allocation6], 0 }
   0x2   :  { %13 = vsyncpa [#allocation9], 0 }
   0x3   :  { %14 = vsyncpa [#allocation4], 0  ;;  %s1504_s21 = smov [#allocation5]   ;;  %s1505_s23 = smov [#allocation2]  }
   0x4   :  { %s32_s22 = sshll.u32 %s1504_s21, 4  ;;  %s20_s24 = sshll.u32 %s1505_s23, 4  ;;  %s33_s22 = int_to_ptr.vmem [resolvable:$true] %s32_s22  ;;  %s1548_s24 = int_to_ptr.vmem [resolvable:$true] %s20_s24 }
   0x5   :  { %s1386_s27 = scalar_lea.hbm %s1689_s1, 1024 }
   0x6   :  { %p1387_p0 = scmp.ne.s32.totalorder %s1689_s1, %s1386_s27  ;;  %p1390_p1 = scmp.lt.u32.totalorder %s1386_s27, %s1689_s1 }
   0x8   :  { %p1392_p2 = pnand %p1390_p1, %p1387_p0 }
   0xa   :  { %1395 = shalt.err (!%p1392_p2)
}
   0xb   :  { %s1396_s8 = scalar_lea.vmem %s33_s22, 1024  ;;  %p1401_p4 = scmp.lt.s32.totalorder %s33_s22, %s33_s22 }
   0xc   :  { %p1397_p3 = scmp.ne.s32.totalorder %s33_s22, %s1396_s8  ;;  %p1402_p5 = scmp.lt.s32.totalorder %s1396_s8, %s1396_s8 }
   0xe   :  { %p1403_p6 = por %p1402_p5, %p1401_p4 }
  0x10   :  { %p1404_p7 = pnand %p1403_p6, %p1397_p3 }
  0x12   :  { %1407 = shalt.err (!%p1404_p7)
}
  0x13   :  { %s1506_s9 = smov 64   ;;  %s1507_s10 = smov 4  }
  0x14   :  { %38 = dma.hbm_to_vmem [thread:$0]  %s1689_s1, 1024, %s33_s22, [#allocation6], %s1506_s9, %s1506_s9, %s1507_s10  }
  0x15   :  { %s1408_s15 = scalar_lea.hbm %s1688_s0, 1024 }
  0x16   :  { %p1409_p8 = scmp.ne.s32.totalorder %s1688_s0, %s1408_s15  ;;  %p1412_p9 = scmp.lt.u32.totalorder %s1408_s15, %s1688_s0 }
  0x18   :  { %p1414_p10 = pnand %p1412_p9, %p1409_p8 }
  0x1a   :  { %1417 = shalt.err (!%p1414_p10)
}
  0x1b   :  { %s1418_s20 = scalar_lea.vmem %s1548_s24, 1024  ;;  %p1423_p12 = scmp.lt.s32.totalorder %s1548_s24, %s1548_s24 }
  0x1c   :  { %p1419_p11 = scmp.ne.s32.totalorder %s1548_s24, %s1418_s20  ;;  %p1424_p13 = scmp.lt.s32.totalorder %s1418_s20, %s1418_s20 }
  0x1e   :  { %p1425_p0 = por %p1424_p13, %p1423_p12 }
  0x20   :  { %p1426_p1 = pnand %p1425_p0, %p1419_p11 }
  0x22   :  { %1429 = shalt.err (!%p1426_p1)
}
  0x23   :  { %26 = dma.hbm_to_vmem [thread:$0]  %s1688_s0, 1024, %s1548_s24, [#allocation3], %s1506_s9, %s1506_s9, %s1507_s10  }
  0x24   :  { %s1508_s22 = smov [#allocation7]   ;;  %s1509_s25 = smov [#allocation8]  }
  0x25   :  { %s44_s23 = sshll.u32 %s1508_s22, 4  ;;  %s58_s26 = sshll.u32 %s1509_s25, 4  ;;  %s45_s23 = int_to_ptr.vmem [resolvable:$true] %s44_s23  ;;  %s1585_s26 = int_to_ptr.vmem [resolvable:$true] %s58_s26 }
  0x26   :  { %s1430_s29 = scalar_lea.hbm %s1690_s2, 1024 }
  0x27   :  { %p1431_p2 = scmp.ne.s32.totalorder %s1690_s2, %s1430_s29  ;;  %p1434_p3 = scmp.lt.u32.totalorder %s1430_s29, %s1690_s2 }
  0x29   :  { %p1436_p4 = pnand %p1434_p3, %p1431_p2 }
  0x2b   :  { %1439 = shalt.err (!%p1436_p4)
}
  0x2c   :  { %s1440_s0 = scalar_lea.vmem %s45_s23, 1024  ;;  %p1445_p6 = scmp.lt.s32.totalorder %s45_s23, %s45_s23 }
  0x2d   :  { %p1441_p5 = scmp.ne.s32.totalorder %s45_s23, %s1440_s0  ;;  %p1446_p7 = scmp.lt.s32.totalorder %s1440_s0, %s1440_s0 }
  0x2f   :  { %p1447_p8 = por %p1446_p7, %p1445_p6 }
  0x31   :  { %p1448_p9 = pnand %p1447_p8, %p1441_p5 }
  0x33   :  { %1451 = shalt.err (!%p1448_p9)
}
  0x34   :  { %50 = dma.hbm_to_vmem [thread:$0]  %s1690_s2, 1024, %s45_s23, [#allocation6], %s1506_s9, %s1506_s9, %s1507_s10  }
  0x35   :  { %s1452_s15 = scalar_lea.hbm %s1692_s4, 1024 }
  0x36   :  { %p1453_p10 = scmp.ne.s32.totalorder %s1692_s4, %s1452_s15  ;;  %p1456_p11 = scmp.lt.u32.totalorder %s1452_s15, %s1692_s4 }
  0x38   :  { %p1458_p12 = pnand %p1456_p11, %p1453_p10 }
  0x3a   :  { %1461 = shalt.err (!%p1458_p12)
}
  0x3b   :  { %s1462_s20 = scalar_lea.vmem %s1585_s26, 1024  ;;  %p1467_p0 = scmp.lt.s32.totalorder %s1585_s26, %s1585_s26 }
  0x3c   :  { %p1463_p13 = scmp.ne.s32.totalorder %s1585_s26, %s1462_s20  ;;  %p1468_p1 = scmp.lt.s32.totalorder %s1462_s20, %s1462_s20 }
  0x3e   :  { %p1469_p2 = por %p1468_p1, %p1467_p0 }
  0x40   :  { %p1470_p3 = pnand %p1469_p2, %p1463_p13 }
  0x42   :  { %1473 = shalt.err (!%p1470_p3)
}
  0x43   :  { %64 = dma.hbm_to_vmem [thread:$0]  %s1692_s4, 1024, %s1585_s26, [#allocation9], %s1506_s9, %s1506_s9, %s1507_s10  }
  0x44   :  { %1496 = dma.done.wait [#allocation3], 1024  }
  0x45   :  { %1497 = vsyncadd [#allocation3], 4294966272 }
  0x46   :  { %1498 = dma.done.wait [#allocation6], 2048  }
  0x47   :  { %1499 = vsyncadd [#allocation6], 4294965248 }
  0x48   :  { %1500 = dma.done.wait [#allocation9], 1024  }
  0x49   :  { %1501 = vsyncadd [#allocation9], 4294966272  ;;  %v1354_v0 = vld [vmem:[#allocation7] sm:$0xff]   ;;  %v1355_v1 = vld [vmem:[#allocation7 + $0x8] sm:$0xff]  }
  0x4a   :  { %1153 = vmatprep.subr.bf16.mxu0 %v1354_v0  ;;  %v1356_v2 = vld [vmem:[#allocation7 + $0x10] sm:$0xff]   ;;  %v1357_v3 = vld [vmem:[#allocation7 + $0x18] sm:$0xff]   ;;  %v1362_v4 = vld [vmem:[#allocation5] sm:$0xff]  }
  0x4b   :  { %1154 = vmatpush3.bf16.msra.mxu0 %v1354_v0  ;;  %1169 = vmatprep.mubr.bf16.mxu0 %v1362_v4  ;;  %v1358_v5 = vld [vmem:[#allocation7 + $0x20] sm:$0xff]   ;;  %v1359_v6 = vld [vmem:[#allocation7 + $0x28] sm:$0xff]   ;;  %v1360_v7 = vld [vmem:[#allocation7 + $0x30] sm:$0xff]  }
  0x4c   :  { %1155 = vmatprep.subr.bf16.mxu0 %v1355_v1  ;;  %v1361_v8 = vld [vmem:[#allocation7 + $0x38] sm:$0xff]   ;;  %v1363_v9 = vld [vmem:[#allocation5 + $0x8] sm:$0xff]   ;;  %v1364_v10 = vld [vmem:[#allocation5 + $0x10] sm:$0xff]  }
  0x4d   :  { %v1365_v11 = vld [vmem:[#allocation5 + $0x18] sm:$0xff]   ;;  %v1366_v12 = vld [vmem:[#allocation5 + $0x20] sm:$0xff]   ;;  %v1367_v13 = vld [vmem:[#allocation5 + $0x28] sm:$0xff]  }
  0x4e   :  { %v1368_v14 = vld [vmem:[#allocation5 + $0x30] sm:$0xff]   ;;  %v1369_v15 = vld [vmem:[#allocation5 + $0x38] sm:$0xff]   ;;  %v1622_v16 = vld [vmem:[#allocation2] sm:$0xff]  }
  0x4f   :  { %1156 = vmatpush3.bf16.msra.mxu0 %v1355_v1  ;;  %1201 = vmatprep.mubr.bf16.mxu1 %v1622_v16  ;;  %v1626_v41 = vld [vmem:[#allocation2 + $0x8] sm:$0xff]   ;;  %v1628_v42 = vld [vmem:[#allocation2 + $0x10] sm:$0xff]   ;;  %v1632_v43 = vld [vmem:[#allocation2 + $0x18] sm:$0xff]  }
  0x50   :  { %1157 = vmatprep.subr.bf16.mxu0 %v1356_v2  ;;  %v1634_v44 = vld [vmem:[#allocation2 + $0x20] sm:$0xff]   ;;  %v1638_v45 = vld [vmem:[#allocation2 + $0x28] sm:$0xff]   ;;  %v1640_v46 = vld [vmem:[#allocation2 + $0x30] sm:$0xff]  }
  0x51   :  { %v1644_v47 = vld [vmem:[#allocation2 + $0x38] sm:$0xff]   ;;  %v1378_v48 = vld [vmem:[#allocation8] sm:$0xff]   ;;  %v1379_v49 = vld [vmem:[#allocation8 + $0x8] sm:$0xff]  }
  0x52   :  { %v1380_v50 = vld [vmem:[#allocation8 + $0x10] sm:$0xff]   ;;  %v1381_v51 = vld [vmem:[#allocation8 + $0x18] sm:$0xff]   ;;  %v1382_v52 = vld [vmem:[#allocation8 + $0x20] sm:$0xff]  }
  0x53   :  { %1158 = vmatpush3.bf16.msra.mxu0 %v1356_v2  ;;  %v1383_v53 = vld [vmem:[#allocation8 + $0x28] sm:$0xff]  }
  0x54   :  { %1159 = vmatprep.subr.bf16.mxu0 %v1357_v3 }
  0x57   :  { %1160 = vmatpush3.bf16.msra.mxu0 %v1357_v3 }
  0x58   :  { %1161 = vmatprep.subr.bf16.mxu0 %v1358_v5 }
  0x5b   :  { %1162 = vmatpush3.bf16.msra.mxu0 %v1358_v5 }
  0x5c   :  { %1163 = vmatprep.subr.bf16.mxu0 %v1359_v6 }
  0x5f   :  { %1164 = vmatpush3.bf16.msra.mxu0 %v1359_v6 }
  0x60   :  { %1165 = vmatprep.subr.bf16.mxu0 %v1360_v7 }
  0x63   :  { %1166 = vmatpush3.bf16.msra.mxu0 %v1360_v7 }
  0x64   :  { %1167 = vmatprep.subr.bf16.mxu0 %v1361_v8 }
  0x67   :  { %1168 = vmatpush3.bf16.msra.mxu0 %v1361_v8 }
  0x6a   :  { %1170 = vmatmul.mubr.bf16.vlgmr.msra.gmra.mrb[0].mxu0 %v1363_v9 }
  0x6b   :  { %1173 = vmatprep.mubr.bf16.mxu0 %v1364_v10 }
  0x72   :  { %1174 = vmatmul.mubr.bf16.gmra.mrb[4].mxu0 %v1365_v11 }
  0x73   :  { %1177 = vmatprep.mubr.bf16.mxu0 %v1366_v12 }
  0x7a   :  { %1178 = vmatmul.mubr.bf16.gmra.mrb[8].mxu0 %v1367_v13 }
  0x7b   :  { %1181 = vmatprep.mubr.bf16.mxu0 %v1368_v14  ;;  %v1384_v14 = vld [vmem:[#allocation8 + $0x30] sm:$0xff]  }
  0x82   :  { %1182 = vmatmul.mubr.bf16.gmra.mrb[12].mxu0 %v1369_v15  ;;  %v1385_v15 = vld [vmem:[#allocation8 + $0x38] sm:$0xff]  }
  0x83   :  { %1233 = vmatprep.mubr.bf16.mxu0 %v1622_v16 }
 0x13d   :  { %v1171_v17 = vpop.f32.mrb[0].mxu0 }
 0x13e   :  { %v258_v18 = vpop.f32.mrb[1].mxu0 }
 0x13f   :  { %v1172_v19 = vpop.f32.mrb[2].mxu0 }
 0x140   :  { %v322_v20 = vpack.c.bf16 %v1172_v19, %v1171_v17  ;;  %v261_v21 = vpop.f32.mrb[3].mxu0  ;;  %v1047_v17 = vld [vmem:[%s1691_s3] ss:$0 sm:$0xff] }
 0x141   :  { %v321_v22 = vpack.c.bf16 %v261_v21, %v258_v18 }
 0x143   :  { %1185 = vmatprep.subr.bf16.mxu1 %v321_v22 }
 0x144   :  { %1186 = vmatpush3.bf16.msra.mxu1 %v321_v22 }
 0x145   :  { %v1175_v23 = vpop.f32.mrb[4].mxu0  ;;  %1187 = vmatprep.subr.bf16.mxu1 %v322_v20 }
 0x146   :  { %v274_v24 = vpop.f32.mrb[5].mxu0 }
 0x147   :  { %v1176_v25 = vpop.f32.mrb[6].mxu0 }
 0x148   :  { %v324_v26 = vpack.c.bf16 %v1176_v25, %v1175_v23  ;;  %v277_v27 = vpop.f32.mrb[7].mxu0  ;;  %1188 = vmatpush3.bf16.msra.mxu1 %v322_v20 }
 0x149   :  { %v323_v28 = vpack.c.bf16 %v277_v27, %v274_v24 }
 0x14b   :  { %1189 = vmatprep.subr.bf16.mxu1 %v323_v28 }
 0x14c   :  { %1190 = vmatpush3.bf16.msra.mxu1 %v323_v28 }
 0x14d   :  { %v1179_v29 = vpop.f32.mrb[8].mxu0  ;;  %1191 = vmatprep.subr.bf16.mxu1 %v324_v26 }
 0x14e   :  { %v290_v30 = vpop.f32.mrb[9].mxu0 }
 0x14f   :  { %v1180_v31 = vpop.f32.mrb[10].mxu0 }
 0x150   :  { %v326_v32 = vpack.c.bf16 %v1180_v31, %v1179_v29  ;;  %v293_v33 = vpop.f32.mrb[11].mxu0  ;;  %1192 = vmatpush3.bf16.msra.mxu1 %v324_v26 }
 0x151   :  { %v325_v34 = vpack.c.bf16 %v293_v33, %v290_v30 }
 0x153   :  { %1193 = vmatprep.subr.bf16.mxu1 %v325_v34 }
 0x154   :  { %1194 = vmatpush3.bf16.msra.mxu1 %v325_v34 }
 0x155   :  { %v1183_v35 = vpop.f32.mrb[12].mxu0  ;;  %1195 = vmatprep.subr.bf16.mxu1 %v326_v32 }
 0x156   :  { %v306_v36 = vpop.f32.mrb[13].mxu0 }
 0x157   :  { %v1184_v37 = vpop.f32.mrb[14].mxu0 }
 0x158   :  { %v328_v38 = vpack.c.bf16 %v1184_v37, %v1183_v35  ;;  %v309_v39 = vpop.f32.mrb[15].mxu0  ;;  %1196 = vmatpush3.bf16.msra.mxu1 %v326_v32 }
 0x159   :  { %v327_v40 = vpack.c.bf16 %v309_v39, %v306_v36 }
 0x15b   :  { %1197 = vmatprep.subr.bf16.mxu1 %v327_v40 }
 0x15c   :  { %1198 = vmatpush3.bf16.msra.mxu1 %v327_v40 }
 0x15d   :  { %1199 = vmatprep.subr.bf16.mxu1 %v328_v38 }
 0x160   :  { %1200 = vmatpush3.bf16.msra.mxu1 %v328_v38 }
 0x161   :  { %1249 = vmatprep.subr.bf16.mxu1 %v1378_v48 }
 0x163   :  { %1202 = vmatmul.mubr.bf16.vlgmr.msra.gmra.mrb[0].mxu1 %v1626_v41 }
 0x164   :  { %1205 = vmatprep.mubr.bf16.mxu1 %v1628_v42  ;;  %1250 = vmatpush3.bf16.msra.mxu1 %v1378_v48 }
 0x165   :  { %1251 = vmatprep.subr.bf16.mxu1 %v1379_v49 }
 0x168   :  { %1252 = vmatpush3.bf16.msra.mxu1 %v1379_v49 }
 0x169   :  { %1253 = vmatprep.subr.bf16.mxu1 %v1380_v50 }
 0x16b   :  { %1206 = vmatmul.mubr.bf16.gmra.mrb[4].mxu1 %v1632_v43 }
 0x16c   :  { %1209 = vmatprep.mubr.bf16.mxu1 %v1634_v44  ;;  %1254 = vmatpush3.bf16.msra.mxu1 %v1380_v50 }
 0x16d   :  { %1255 = vmatprep.subr.bf16.mxu1 %v1381_v51 }
 0x170   :  { %1256 = vmatpush3.bf16.msra.mxu1 %v1381_v51 }
 0x171   :  { %1257 = vmatprep.subr.bf16.mxu1 %v1382_v52 }
 0x173   :  { %1210 = vmatmul.mubr.bf16.gmra.mrb[8].mxu1 %v1638_v45 }
 0x174   :  { %1213 = vmatprep.mubr.bf16.mxu1 %v1640_v46  ;;  %1258 = vmatpush3.bf16.msra.mxu1 %v1382_v52 }
 0x175   :  { %1259 = vmatprep.subr.bf16.mxu1 %v1383_v53 }
 0x178   :  { %1260 = vmatpush3.bf16.msra.mxu1 %v1383_v53 }
 0x179   :  { %1261 = vmatprep.subr.bf16.mxu1 %v1384_v14 }
 0x17b   :  { %1214 = vmatmul.mubr.bf16.gmra.mrb[12].mxu1 %v1644_v47 }
 0x17c   :  { %1262 = vmatpush3.bf16.msra.mxu1 %v1384_v14 }
 0x17d   :  { %1263 = vmatprep.subr.bf16.mxu1 %v1385_v15 }
 0x180   :  { %1264 = vmatpush3.bf16.msra.mxu1 %v1385_v15 }
 0x236   :  { %v1203_v54 = vpop.f32.mrb[0].mxu1 }
 0x237   :  { %v411_v55 = vpop.f32.mrb[1].mxu1 }
 0x238   :  { %v1204_v56 = vpop.f32.mrb[2].mxu1 }
 0x239   :  { %v475_v57 = vpack.c.bf16 %v1204_v56, %v1203_v54  ;;  %v414_v58 = vpop.f32.mrb[3].mxu1 }
 0x23a   :  { %v474_v59 = vpack.c.bf16 %v414_v58, %v411_v55 }
 0x23c   :  { %1217 = vmatprep.subr.bf16.mxu0 %v474_v59 }
 0x23d   :  { %1218 = vmatpush3.bf16.msra.mxu0 %v474_v59 }
 0x23e   :  { %v1207_v60 = vpop.f32.mrb[4].mxu1  ;;  %1219 = vmatprep.subr.bf16.mxu0 %v475_v57 }
 0x23f   :  { %v427_v61 = vpop.f32.mrb[5].mxu1 }
 0x240   :  { %v1208_v62 = vpop.f32.mrb[6].mxu1 }
 0x241   :  { %v477_v63 = vpack.c.bf16 %v1208_v62, %v1207_v60  ;;  %v430_v0 = vpop.f32.mrb[7].mxu1  ;;  %1220 = vmatpush3.bf16.msra.mxu0 %v475_v57 }
 0x242   :  { %v476_v1 = vpack.c.bf16 %v430_v0, %v427_v61 }
 0x244   :  { %1221 = vmatprep.subr.bf16.mxu0 %v476_v1 }
 0x245   :  { %1222 = vmatpush3.bf16.msra.mxu0 %v476_v1 }
 0x246   :  { %v1211_v2 = vpop.f32.mrb[8].mxu1  ;;  %1223 = vmatprep.subr.bf16.mxu0 %v477_v63 }
 0x247   :  { %v443_v3 = vpop.f32.mrb[9].mxu1 }
 0x248   :  { %v1212_v4 = vpop.f32.mrb[10].mxu1 }
 0x249   :  { %v479_v5 = vpack.c.bf16 %v1212_v4, %v1211_v2  ;;  %v446_v6 = vpop.f32.mrb[11].mxu1  ;;  %1224 = vmatpush3.bf16.msra.mxu0 %v477_v63 }
 0x24a   :  { %v478_v7 = vpack.c.bf16 %v446_v6, %v443_v3 }
 0x24c   :  { %1225 = vmatprep.subr.bf16.mxu0 %v478_v7 }
 0x24d   :  { %1226 = vmatpush3.bf16.msra.mxu0 %v478_v7 }
 0x24e   :  { %v1215_v8 = vpop.f32.mrb[12].mxu1  ;;  %1227 = vmatprep.subr.bf16.mxu0 %v479_v5 }
 0x24f   :  { %v459_v9 = vpop.f32.mrb[13].mxu1 }
 0x250   :  { %v1216_v10 = vpop.f32.mrb[14].mxu1 }
 0x251   :  { %v481_v11 = vpack.c.bf16 %v1216_v10, %v1215_v8  ;;  %v462_v12 = vpop.f32.mrb[15].mxu1  ;;  %1228 = vmatpush3.bf16.msra.mxu0 %v479_v5 }
 0x252   :  { %v480_v13 = vpack.c.bf16 %v462_v12, %v459_v9 }
 0x254   :  { %1229 = vmatprep.subr.bf16.mxu0 %v480_v13 }
 0x255   :  { %1230 = vmatpush3.bf16.msra.mxu0 %v480_v13 }
 0x256   :  { %1231 = vmatprep.subr.bf16.mxu0 %v481_v11 }
 0x259   :  { %1232 = vmatpush3.bf16.msra.mxu0 %v481_v11 }
 0x25c   :  { %1234 = vmatmul.mubr.bf16.vlgmr.msra.gmra.mrb[16].mxu0 %v1626_v41 }
 0x25d   :  { %1237 = vmatprep.mubr.bf16.mxu0 %v1628_v42 }
 0x264   :  { %1238 = vmatmul.mubr.bf16.gmra.mrb[20].mxu0 %v1632_v43 }
 0x265   :  { %1241 = vmatprep.mubr.bf16.mxu0 %v1634_v44 }
 0x26c   :  { %1242 = vmatmul.mubr.bf16.gmra.mrb[24].mxu0 %v1638_v45 }
 0x26d   :  { %1245 = vmatprep.mubr.bf16.mxu0 %v1640_v46 }
 0x274   :  { %1246 = vmatmul.mubr.bf16.gmra.mrb[28].mxu0 %v1644_v47 }
 0x275   :  { %1297 = vmatprep.mubr.bf16.mxu0 %v1622_v16 }
 0x32f   :  { %v1235_v18 = vpop.f32.mrb[16].mxu0 }
 0x330   :  { %v532_v19 = vadd.f32 %v1235_v18, %v1047_v17  ;;  %v523_v20 = vpop.f32.mrb[17].mxu0 }
 0x331   :  { %v524_v21 = vadd.f32 %v1047_v17, %v523_v20  ;;  %v1236_v22 = vpop.f32.mrb[18].mxu0 }
 0x332   :  { %v535_v23 = vadd.f32 %v1236_v22, %v1047_v17  ;;  %v526_v24 = vpop.f32.mrb[19].mxu0  ;;  %v588_v26 = vmax.f32 %v532_v19, 0.0 }
 0x333   :  { %v527_v25 = vadd.f32 %v1047_v17, %v526_v24  ;;  %v586_v28 = vmax.f32 %v524_v21, 0.0 }
 0x334   :  { %v589_v27 = vmax.f32 %v535_v23, 0.0 }
 0x335   :  { %v587_v29 = vmax.f32 %v527_v25, 0.0 }
 0x336   :  { %v603_v30 = vpack.c.bf16 %v589_v27, %v588_v26 }
 0x337   :  { %v602_v31 = vpack.c.bf16 %v587_v29, %v586_v28  ;;  %v1239_v32 = vpop.f32.mrb[20].mxu0 }
 0x338   :  { %v548_v33 = vadd.f32 %v1239_v32, %v1047_v17  ;;  %v539_v34 = vpop.f32.mrb[21].mxu0 }
 0x339   :  { %v540_v35 = vadd.f32 %v1047_v17, %v539_v34  ;;  %v1240_v36 = vpop.f32.mrb[22].mxu0  ;;  %1265 = vmatprep.mubr.bf16.mxu1 %v602_v31 }
 0x33a   :  { %v551_v37 = vadd.f32 %v1240_v36, %v1047_v17  ;;  %v542_v38 = vpop.f32.mrb[23].mxu0  ;;  %1266 = vmatmul.mubr.bf16.vlgmr.msra.gmra.mrb[16].mxu1 %v603_v30  ;;  %v592_v40 = vmax.f32 %v548_v33, 0.0 }
 0x33b   :  { %v543_v39 = vadd.f32 %v1047_v17, %v542_v38  ;;  %v590_v49 = vmax.f32 %v540_v35, 0.0 }
 0x33c   :  { %v593_v48 = vmax.f32 %v551_v37, 0.0 }
 0x33d   :  { %v591_v50 = vmax.f32 %v543_v39, 0.0 }
 0x33e   :  { %v605_v51 = vpack.c.bf16 %v593_v48, %v592_v40 }
 0x33f   :  { %v604_v52 = vpack.c.bf16 %v591_v50, %v590_v49  ;;  %v1243_v53 = vpop.f32.mrb[24].mxu0 }
 0x340   :  { %v564_v54 = vadd.f32 %v1243_v53, %v1047_v17  ;;  %v555_v55 = vpop.f32.mrb[25].mxu0 }
 0x341   :  { %v556_v56 = vadd.f32 %v1047_v17, %v555_v55  ;;  %v1244_v57 = vpop.f32.mrb[26].mxu0  ;;  %1269 = vmatprep.mubr.bf16.mxu1 %v604_v52 }
 0x342   :  { %v567_v58 = vadd.f32 %v1244_v57, %v1047_v17  ;;  %v558_v59 = vpop.f32.mrb[27].mxu0  ;;  %1270 = vmatmul.mubr.bf16.gmra.mrb[20].mxu1 %v605_v51  ;;  %v596_v61 = vmax.f32 %v564_v54, 0.0 }
 0x343   :  { %v559_v60 = vadd.f32 %v1047_v17, %v558_v59  ;;  %v594_v63 = vmax.f32 %v556_v56, 0.0 }
 0x344   :  { %v597_v62 = vmax.f32 %v567_v58, 0.0 }
 0x345   :  { %v595_v0 = vmax.f32 %v559_v60, 0.0 }
 0x346   :  { %v607_v1 = vpack.c.bf16 %v597_v62, %v596_v61 }
 0x347   :  { %v606_v2 = vpack.c.bf16 %v595_v0, %v594_v63  ;;  %v1247_v3 = vpop.f32.mrb[28].mxu0 }
 0x348   :  { %v580_v4 = vadd.f32 %v1247_v3, %v1047_v17  ;;  %v571_v5 = vpop.f32.mrb[29].mxu0 }
 0x349   :  { %v572_v6 = vadd.f32 %v1047_v17, %v571_v5  ;;  %v1248_v7 = vpop.f32.mrb[30].mxu0  ;;  %1273 = vmatprep.mubr.bf16.mxu1 %v606_v2 }
 0x34a   :  { %v583_v8 = vadd.f32 %v1248_v7, %v1047_v17  ;;  %v574_v9 = vpop.f32.mrb[31].mxu0  ;;  %1274 = vmatmul.mubr.bf16.gmra.mrb[24].mxu1 %v607_v1  ;;  %v600_v11 = vmax.f32 %v580_v4, 0.0 }
 0x34b   :  { %v575_v10 = vadd.f32 %v1047_v17, %v574_v9  ;;  %v598_v13 = vmax.f32 %v572_v6, 0.0 }
 0x34c   :  { %v601_v12 = vmax.f32 %v583_v8, 0.0  ;;  %v1056_v8 = vld [vmem:[%s1693_s5] ss:$0 sm:$0xff]  ;;  %s1510_s5 = smov [#allocation10]  }
 0x34d   :  { %v599_v14 = vmax.f32 %v575_v10, 0.0  ;;  %s1009_s21 = sshll.u32 %s1510_s5, 4  ;;  %s1010_s21 = int_to_ptr.vmem [resolvable:$true] %s1009_s21 }
 0x34e   :  { %v609_v15 = vpack.c.bf16 %v601_v12, %v600_v11  ;;  %s1474_s22 = scalar_lea.vmem %s1010_s21, 2048  ;;  %p1479_p5 = scmp.lt.s32.totalorder %s1010_s21, %s1010_s21 }
 0x34f   :  { %v608_v18 = vpack.c.bf16 %v599_v14, %v598_v13  ;;  %p1475_p4 = scmp.ne.s32.totalorder %s1010_s21, %s1474_s22  ;;  %p1480_p6 = scmp.lt.s32.totalorder %s1474_s22, %s1474_s22 }
 0x351   :  { %1277 = vmatprep.mubr.bf16.mxu1 %v608_v18  ;;  %p1481_p7 = por %p1480_p6, %p1479_p5 }
 0x352   :  { %1278 = vmatmul.mubr.bf16.gmra.mrb[28].mxu1 %v609_v15 }
 0x353   :  { %1329 = vmatprep.mubr.bf16.mxu1 %v1622_v16  ;;  %p1482_p8 = pnand %p1481_p7, %p1475_p4 }
 0x40d   :  { %v1267_v19 = vpop.f32.mrb[16].mxu1 }
 0x40e   :  { %v708_v20 = vpop.f32.mrb[17].mxu1 }
 0x40f   :  { %v1268_v21 = vpop.f32.mrb[18].mxu1 }
 0x410   :  { %v772_v22 = vpack.c.bf16 %v1268_v21, %v1267_v19  ;;  %v711_v23 = vpop.f32.mrb[19].mxu1 }
 0x411   :  { %v771_v24 = vpack.c.bf16 %v711_v23, %v708_v20 }
 0x413   :  { %1281 = vmatprep.subr.bf16.mxu0 %v771_v24 }
 0x414   :  { %1282 = vmatpush3.bf16.msra.mxu0 %v771_v24 }
 0x415   :  { %v1271_v25 = vpop.f32.mrb[20].mxu1  ;;  %1283 = vmatprep.subr.bf16.mxu0 %v772_v22 }
 0x416   :  { %v724_v17 = vpop.f32.mrb[21].mxu1 }
 0x417   :  { %v1272_v26 = vpop.f32.mrb[22].mxu1 }
 0x418   :  { %v774_v27 = vpack.c.bf16 %v1272_v26, %v1271_v25  ;;  %v727_v28 = vpop.f32.mrb[23].mxu1  ;;  %1284 = vmatpush3.bf16.msra.mxu0 %v772_v22 }
 0x419   :  { %v773_v29 = vpack.c.bf16 %v727_v28, %v724_v17 }
 0x41b   :  { %1285 = vmatprep.subr.bf16.mxu0 %v773_v29 }
 0x41c   :  { %1286 = vmatpush3.bf16.msra.mxu0 %v773_v29 }
 0x41d   :  { %v1275_v30 = vpop.f32.mrb[24].mxu1  ;;  %1287 = vmatprep.subr.bf16.mxu0 %v774_v27 }
 0x41e   :  { %v740_v16 = vpop.f32.mrb[25].mxu1 }
 0x41f   :  { %v1276_v31 = vpop.f32.mrb[26].mxu1 }
 0x420   :  { %v776_v32 = vpack.c.bf16 %v1276_v31, %v1275_v30  ;;  %v743_v33 = vpop.f32.mrb[27].mxu1  ;;  %1288 = vmatpush3.bf16.msra.mxu0 %v774_v27 }
 0x421   :  { %v775_v34 = vpack.c.bf16 %v743_v33, %v740_v16 }
 0x423   :  { %1289 = vmatprep.subr.bf16.mxu0 %v775_v34 }
 0x424   :  { %1290 = vmatpush3.bf16.msra.mxu0 %v775_v34 }
 0x425   :  { %v1279_v35 = vpop.f32.mrb[28].mxu1  ;;  %1291 = vmatprep.subr.bf16.mxu0 %v776_v32 }
 0x426   :  { %v756_v36 = vpop.f32.mrb[29].mxu1 }
 0x427   :  { %v1280_v37 = vpop.f32.mrb[30].mxu1 }
 0x428   :  { %v778_v38 = vpack.c.bf16 %v1280_v37, %v1279_v35  ;;  %v759_v39 = vpop.f32.mrb[31].mxu1  ;;  %1292 = vmatpush3.bf16.msra.mxu0 %v776_v32 }
 0x429   :  { %v777_v40 = vpack.c.bf16 %v759_v39, %v756_v36 }
 0x42b   :  { %1293 = vmatprep.subr.bf16.mxu0 %v777_v40 }
 0x42c   :  { %1294 = vmatpush3.bf16.msra.mxu0 %v777_v40 }
 0x42d   :  { %1295 = vmatprep.subr.bf16.mxu0 %v778_v38 }
 0x430   :  { %1296 = vmatpush3.bf16.msra.mxu0 %v778_v38 }
 0x433   :  { %1298 = vmatmul.mubr.bf16.vlgmr.msra.gmra.mrb[32].mxu0 %v1626_v41 }
 0x434   :  { %1301 = vmatprep.mubr.bf16.mxu0 %v1628_v42 }
 0x43b   :  { %1302 = vmatmul.mubr.bf16.gmra.mrb[36].mxu0 %v1632_v43 }
 0x43c   :  { %1305 = vmatprep.mubr.bf16.mxu0 %v1634_v44 }
 0x443   :  { %1306 = vmatmul.mubr.bf16.gmra.mrb[40].mxu0 %v1638_v45 }
 0x444   :  { %1309 = vmatprep.mubr.bf16.mxu0 %v1640_v46 }
 0x44b   :  { %1310 = vmatmul.mubr.bf16.gmra.mrb[44].mxu0 %v1644_v47 }
 0x506   :  { %v1299_v48 = vpop.f32.mrb[32].mxu0 }
 0x507   :  { %v813_v49 = vpop.f32.mrb[33].mxu0 }
 0x508   :  { %v1300_v50 = vpop.f32.mrb[34].mxu0 }
 0x509   :  { %v877_v51 = vpack.c.bf16 %v1300_v50, %v1299_v48  ;;  %v816_v52 = vpop.f32.mrb[35].mxu0 }
 0x50a   :  { %v876_v53 = vpack.c.bf16 %v816_v52, %v813_v49 }
 0x50c   :  { %1313 = vmatprep.subr.bf16.mxu1 %v876_v53 }
 0x50d   :  { %1314 = vmatpush3.bf16.msra.mxu1 %v876_v53 }
 0x50e   :  { %v1303_v54 = vpop.f32.mrb[36].mxu0  ;;  %1315 = vmatprep.subr.bf16.mxu1 %v877_v51 }
 0x50f   :  { %v829_v55 = vpop.f32.mrb[37].mxu0 }
 0x510   :  { %v1304_v56 = vpop.f32.mrb[38].mxu0 }
 0x511   :  { %v879_v57 = vpack.c.bf16 %v1304_v56, %v1303_v54  ;;  %v832_v58 = vpop.f32.mrb[39].mxu0  ;;  %1316 = vmatpush3.bf16.msra.mxu1 %v877_v51 }
 0x512   :  { %v878_v59 = vpack.c.bf16 %v832_v58, %v829_v55 }
 0x514   :  { %1317 = vmatprep.subr.bf16.mxu1 %v878_v59 }
 0x515   :  { %1318 = vmatpush3.bf16.msra.mxu1 %v878_v59 }
 0x516   :  { %v1307_v60 = vpop.f32.mrb[40].mxu0  ;;  %1319 = vmatprep.subr.bf16.mxu1 %v879_v57 }
 0x517   :  { %v845_v61 = vpop.f32.mrb[41].mxu0 }
 0x518   :  { %v1308_v62 = vpop.f32.mrb[42].mxu0 }
 0x519   :  { %v881_v63 = vpack.c.bf16 %v1308_v62, %v1307_v60  ;;  %v848_v0 = vpop.f32.mrb[43].mxu0  ;;  %1320 = vmatpush3.bf16.msra.mxu1 %v879_v57 }
 0x51a   :  { %v880_v1 = vpack.c.bf16 %v848_v0, %v845_v61 }
 0x51c   :  { %1321 = vmatprep.subr.bf16.mxu1 %v880_v1 }
 0x51d   :  { %1322 = vmatpush3.bf16.msra.mxu1 %v880_v1 }
 0x51e   :  { %v1311_v2 = vpop.f32.mrb[44].mxu0  ;;  %1323 = vmatprep.subr.bf16.mxu1 %v881_v63 }
 0x51f   :  { %v861_v3 = vpop.f32.mrb[45].mxu0 }
 0x520   :  { %v1312_v4 = vpop.f32.mrb[46].mxu0 }
 0x521   :  { %v883_v5 = vpack.c.bf16 %v1312_v4, %v1311_v2  ;;  %v864_v6 = vpop.f32.mrb[47].mxu0  ;;  %1324 = vmatpush3.bf16.msra.mxu1 %v881_v63 }
 0x522   :  { %v882_v7 = vpack.c.bf16 %v864_v6, %v861_v3 }
 0x524   :  { %1325 = vmatprep.subr.bf16.mxu1 %v882_v7 }
 0x525   :  { %1326 = vmatpush3.bf16.msra.mxu1 %v882_v7 }
 0x526   :  { %1327 = vmatprep.subr.bf16.mxu1 %v883_v5 }
 0x529   :  { %1328 = vmatpush3.bf16.msra.mxu1 %v883_v5 }
 0x52c   :  { %1330 = vmatmul.mubr.bf16.vlgmr.msra.gmra.mrb[32].mxu1 %v1626_v41 }
 0x52d   :  { %1333 = vmatprep.mubr.bf16.mxu1 %v1628_v42 }
 0x534   :  { %1334 = vmatmul.mubr.bf16.gmra.mrb[36].mxu1 %v1632_v43 }
 0x535   :  { %1337 = vmatprep.mubr.bf16.mxu1 %v1634_v44 }
 0x53c   :  { %1338 = vmatmul.mubr.bf16.gmra.mrb[40].mxu1 %v1638_v45 }
 0x53d   :  { %1341 = vmatprep.mubr.bf16.mxu1 %v1640_v46 }
 0x544   :  { %1342 = vmatmul.mubr.bf16.gmra.mrb[44].mxu1 %v1644_v47 }
 0x5ff   :  { %v1331_v9 = vpop.f32.mrb[32].mxu1 }
 0x600   :  { %v934_v10 = vadd.f32 %v1331_v9, %v1056_v8  ;;  %v925_v11 = vpop.f32.mrb[33].mxu1 }
 0x601   :  { %v926_v41 = vadd.f32 %v1056_v8, %v925_v11  ;;  %v1332_v12 = vpop.f32.mrb[34].mxu1 }
 0x602   :  { %990 = vst [vmem:[#allocation10 + $0x10] sm:$0xff] %v934_v10  ;;  %v937_v42 = vadd.f32 %v1332_v12, %v1056_v8  ;;  %v928_v43 = vpop.f32.mrb[35].mxu1 }
 0x603   :  { %988 = vst [vmem:[#allocation10] sm:$0xff] %v926_v41  ;;  %v929_v44 = vadd.f32 %v1056_v8, %v928_v43 }
 0x604   :  { %991 = vst [vmem:[#allocation10 + $0x18] sm:$0xff] %v937_v42 }
 0x605   :  { %989 = vst [vmem:[#allocation10 + $0x8] sm:$0xff] %v929_v44 }
 0x607   :  { %v1335_v45 = vpop.f32.mrb[36].mxu1 }
 0x608   :  { %v950_v46 = vadd.f32 %v1335_v45, %v1056_v8  ;;  %v941_v13 = vpop.f32.mrb[37].mxu1 }
 0x609   :  { %v942_v47 = vadd.f32 %v1056_v8, %v941_v13  ;;  %v1336_v14 = vpop.f32.mrb[38].mxu1 }
 0x60a   :  { %994 = vst [vmem:[#allocation10 + $0x30] sm:$0xff] %v950_v46  ;;  %v953_v15 = vadd.f32 %v1336_v14, %v1056_v8  ;;  %v944_v18 = vpop.f32.mrb[39].mxu1 }
 0x60b   :  { %992 = vst [vmem:[#allocation10 + $0x20] sm:$0xff] %v942_v47  ;;  %v945_v19 = vadd.f32 %v1056_v8, %v944_v18 }
 0x60c   :  { %995 = vst [vmem:[#allocation10 + $0x38] sm:$0xff] %v953_v15 }
 0x60d   :  { %993 = vst [vmem:[#allocation10 + $0x28] sm:$0xff] %v945_v19 }
 0x60f   :  { %v1339_v20 = vpop.f32.mrb[40].mxu1 }
 0x610   :  { %v966_v21 = vadd.f32 %v1339_v20, %v1056_v8  ;;  %v957_v22 = vpop.f32.mrb[41].mxu1 }
 0x611   :  { %v958_v23 = vadd.f32 %v1056_v8, %v957_v22  ;;  %v1340_v24 = vpop.f32.mrb[42].mxu1 }
 0x612   :  { %998 = vst [vmem:[#allocation10 + $0x50] sm:$0xff] %v966_v21  ;;  %v969_v25 = vadd.f32 %v1340_v24, %v1056_v8  ;;  %v960_v17 = vpop.f32.mrb[43].mxu1 }
 0x613   :  { %996 = vst [vmem:[#allocation10 + $0x40] sm:$0xff] %v958_v23  ;;  %v961_v26 = vadd.f32 %v1056_v8, %v960_v17 }
 0x614   :  { %999 = vst [vmem:[#allocation10 + $0x58] sm:$0xff] %v969_v25 }
 0x615   :  { %997 = vst [vmem:[#allocation10 + $0x48] sm:$0xff] %v961_v26 }
 0x617   :  { %v1343_v27 = vpop.f32.mrb[44].mxu1 }
 0x618   :  { %v982_v28 = vadd.f32 %v1343_v27, %v1056_v8  ;;  %v973_v29 = vpop.f32.mrb[45].mxu1 }
 0x619   :  { %v974_v30 = vadd.f32 %v1056_v8, %v973_v29  ;;  %v1344_v16 = vpop.f32.mrb[46].mxu1 }
 0x61a   :  { %1002 = vst [vmem:[#allocation10 + $0x70] sm:$0xff] %v982_v28  ;;  %v985_v31 = vadd.f32 %v1344_v16, %v1056_v8  ;;  %v976_v32 = vpop.f32.mrb[47].mxu1 }
 0x61b   :  { %1000 = vst [vmem:[#allocation10 + $0x60] sm:$0xff] %v974_v30  ;;  %v977_v33 = vadd.f32 %v1056_v8, %v976_v32 }
 0x61c   :  { %1003 = vst [vmem:[#allocation10 + $0x78] sm:$0xff] %v985_v31 }
 0x61d   :  { %1001 = vst [vmem:[#allocation10 + $0x68] sm:$0xff] %v977_v33 }
 0x61e   :  { %1485 = shalt.err (!%p1482_p8)
}
 0x61f   :  { %s1486_s26 = scalar_lea.hbm %s1694_s6, 2048 }
 0x620   :  { %p1487_p9 = scmp.ne.s32.totalorder %s1694_s6, %s1486_s26  ;;  %p1490_p10 = scmp.lt.u32.totalorder %s1486_s26, %s1694_s6 }
 0x622   :  { %p1492_p11 = pnand %p1490_p10, %p1487_p9 }
 0x624   :  { %1495 = shalt.err (!%p1492_p11)
}
 0x625   :  { %s1511_s7 = smov 128   ;;  %s1512_s8 = smov 8  }
 0x626   :  { %1015 = dma.vmem_to_hbm [thread:$0]  %s1010_s21, 2048, %s1694_s6, [#allocation4], %s1511_s7, %s1511_s7, %s1512_s8  }
 0x627   :  { %1502 = dma.done.wait [#allocation4], 2048  }
 0x628   :  { %1503 = vsyncadd [#allocation4], 4294965248 }
 0x629   :  { %1019 = vsyncpa [#allocation3], 1 }
 0x62a   :  { %1020 = vsyncpa [#allocation6], 1 }
 0x62b   :  { %1021 = vsyncpa [#allocation9], 1 }
 0x62c   :  { %1022 = vsyncpa [#allocation4], 1 }

</bundles_post_ra>
